<compile_context>
chip_gen: v7x
topology: tpu7x:2x2x1
jax: 0.10.0
libtpu: 0.0.40
codegen_flags: <defaults>
</compile_context>

<pallas_src>
import functools

import jax
import jax.numpy as jnp
from jax.experimental import pallas as pl
from jax.experimental.pallas import tpu as pltpu

_LANES = 128
_SUBLANES = 8
_MAX_TILE_ROWS = 2048     # (2048,128) f32 block = 1 MiB ~ 85% HBM-roofline knee
_NUM_CORES = 2            # leading "parallel" grid axis -> both TCs on v7x
# BCE(x=_PAD_LOGIT, t=0) == 0.0 exactly because exp(-1e4) underflows in f32.
# Do NOT reduce |_PAD_LOGIT| below ~104 (f32 exp underflow threshold).
_PAD_LOGIT = -1.0e4


def _elementwise_bce(x_ref, t_ref):
    """Numerically stable BCE with logits, computed in f32 (same as PyTorch)."""
    x = x_ref[...].astype(jnp.float32)
    t = t_ref[...].astype(jnp.float32)
    return jnp.maximum(x, 0.0) - x * t + jnp.log1p(jnp.exp(-jnp.abs(x)))


def _fused_bce_kernel(x0_ref, t0_ref, x1_ref, t1_ref, o_ref,
                      acc0_ref, acc1_ref, *,
                      nb0, nb1, s0, s1, tile0, tile1, rows0, rows1,
                      nsteps, scale0, scale1, mask0, mask1):
    c = pl.program_id(0)          # core index ("parallel")
    i = pl.program_id(1)          # per-core reduction step ("arbitrary")

    @pl.when(i == 0)
    def _init():
        acc0_ref[...] = jnp.zeros_like(acc0_ref)
        acc1_ref[...] = jnp.zeros_like(acc1_ref)

    def _accumulate(x_ref, t_ref, acc_ref, nb, s, tile, rows, need_mask):
        blk = c * s + i           # this head's global block id for (c, i)

        @pl.when((i < s) & (blk < nb))
        def _():
            bce = _elementwise_bce(x_ref, t_ref)
            if need_mask:         # static: rows % tile != 0 -> last block overhangs
                row = (blk * tile +
                       jax.lax.broadcasted_iota(jnp.int32, (tile, _LANES), 0))
                bce = jnp.where(row < rows, bce, 0.0)
            # Reduce the tile to (8,128) with pure vreg VALU adds; keeps the
            # accumulator (and its per-step load/store) tiny.
            acc_ref[...] += bce.reshape(
                tile // _SUBLANES, _SUBLANES, _LANES).sum(axis=0)

    _accumulate(x0_ref, t0_ref, acc0_ref, nb0, s0, tile0, rows0, mask0)
    _accumulate(x1_ref, t1_ref, acc1_ref, nb1, s1, tile1, rows1, mask1)

    @pl.when(i == nsteps - 1)
    def _finalize():
        # Lane-dense per-core partial sums; mean (1/N) and loss weights folded
        # into per-head scales. Cross-lane/core reduce happens in the wrapper.
        o_ref[...] = (acc0_ref[...] * jnp.float32(scale0) +
                      acc1_ref[...] * jnp.float32(scale1))


def _prep(x, t):
    """Flatten to (rows, 128), copy-free whenever x.size is a multiple of 128.

    Misaligned sizes are padded with (logit=-1e4, target=0), whose BCE term is
    exactly 0.0 in f32 (exp underflow), so no in-kernel masking of the padded
    elements is needed.  Dtypes are preserved (the kernel casts to f32), so
    bf16 / int8 targets halve HBM traffic.
    """
    assert x.shape == t.shape
    n = x.size
    rows = max(_SUBLANES, pl.cdiv(n, _LANES))
    pad = rows * _LANES - n
    xf = jnp.ravel(x)
    tf = jnp.ravel(t)
    if pad:
        # TODO(synk): a fully copy-free path for n % 128 != 0 would need 1-D
        # blocking + per-element tail masking; only misaligned sizes pay this.
        xf = jnp.pad(xf, (0, pad), constant_values=_PAD_LOGIT)
        tf = jnp.pad(tf, (0, pad), constant_values=0)
    return xf.reshape(rows, _LANES), tf.reshape(rows, _LANES), rows


def _pick_tile(rows):
    """Per-head tile rows: multiple of 8, <= rows, >= 2 blocks when possible."""
    if rows < 2 * _SUBLANES:
        return _SUBLANES
    return min(_MAX_TILE_ROWS,
               max(_SUBLANES, (rows // (_NUM_CORES * _SUBLANES)) * _SUBLANES))


def _make_index_map(s, nb):
    def index_map(c, i):
        # Clamp to this core's last block (then to the head's last block) so
        # inactive trailing steps keep a constant index -> no redundant DMA.
        return (jnp.minimum(c * s + jnp.minimum(i, s - 1), nb - 1), 0)
    return index_map


def _fused_weighted_bce_mean(x0, t0, x1, t1, w0, w1):
    n0, n1 = x0.size, x1.size
    if n0 == 0 or n1 == 0:
        raise ValueError("CustomBCEWithLogitsLoss: empty input (mean undefined).")

    x0t, t0t, rows0 = _prep(x0, t0)
    x1t, t1t, rows1 = _prep(x1, t1)

    tile0 = _pick_tile(rows0)
    tile1 = _pick_tile(rows1)
    nb0 = pl.cdiv(rows0, tile0)
    nb1 = pl.cdiv(rows1, tile1)
    s0 = pl.cdiv(nb0, _NUM_CORES)       # blocks per core, head 0
    s1 = pl.cdiv(nb1, _NUM_CORES)       # blocks per core, head 1
    nsteps = max(s0, s1)

    # Mean (1/N) and loss weights folded into per-head scales.  (Note: sum
    # first, scale once -> different rounding order than mean-then-multiply;
    # fine in f32 at rtol 1e-5.)
    scale0 = float(w0) / float(n0)
    scale1 = float(w1) / float(n1)

    kernel = functools.partial(
        _fused_bce_kernel,
        nb0=nb0, nb1=nb1, s0=s0, s1=s1, tile0=tile0, tile1=tile1,
        rows0=rows0, rows1=rows1, nsteps=nsteps,
        scale0=scale0, scale1=scale1,
        mask0=(rows0 % tile0) != 0, mask1=(rows1 % tile1) != 0)

    head0_spec = pl.BlockSpec((tile0, _LANES), _make_index_map(s0, nb0))
    head1_spec = pl.BlockSpec((tile1, _LANES), _make_index_map(s1, nb1))

    partials = pl.pallas_call(
        kernel,
        out_shape=jax.ShapeDtypeStruct((_NUM_CORES * _SUBLANES, _LANES),
                                       jnp.float32),
        grid_spec=pltpu.PrefetchScalarGridSpec(
            num_scalar_prefetch=0,
            grid=(_NUM_CORES, nsteps),
            in_specs=[head0_spec, head0_spec, head1_spec, head1_spec],
            out_specs=pl.BlockSpec((_SUBLANES, _LANES), lambda c, i: (c, 0)),
            scratch_shapes=[pltpu.VMEM((_SUBLANES, _LANES), jnp.float32),
                            pltpu.VMEM((_SUBLANES, _LANES), jnp.float32)],
        ),
        compiler_params=pltpu.CompilerParams(
            dimension_semantics=("parallel", "arbitrary"),
            vmem_limit_bytes=32 * 1024 * 1024,
        ),
    )(x0t, t0t, x1t, t1t)

    # Tiny (16,128) reduce done by XLA outside the kernel.
    return jnp.sum(partials)


class CustomBCEWithLogitsLoss:
    """JAX/Pallas port of the PyTorch CustomBCEWithLogitsLoss module."""

    def __init__(self, weight=(1, 1)):
        self.weight = weight

    def __call__(self, inputs, targets):
        assert isinstance(inputs, tuple)
        return _fused_weighted_bce_mean(
            inputs[0], targets[0], inputs[1], targets[1],
            self.weight[0], self.weight[1])


def _reference(inputs, targets, weight):
    def bce(x, t):
        x = x.astype(jnp.float32)
        t = t.astype(jnp.float32)
        l = jnp.maximum(x, 0.0) - x * t + jnp.log1p(jnp.exp(-jnp.abs(x)))
        return jnp.mean(l)

    return (bce(inputs[0], targets[0]) * weight[0]
            + bce(inputs[1], targets[1]) * weight[1])


if __name__ == "__main__":
    key = jax.random.PRNGKey(0)
    keys = jax.random.split(key, 8)

    loss_fn = CustomBCEWithLogitsLoss(weight=(1.0, 0.5))

    # Case 1: lane-aligned NCHW logits (zero-copy path, 2-block/2-core split).
    x0 = jax.random.normal(keys[0], (2, 4, 16, 16), dtype=jnp.float32)   # 2048 elems
    x1 = jax.random.normal(keys[1], (2, 1, 16, 16), dtype=jnp.float32)   # 512 elems
    t0 = (jax.random.uniform(keys[2], (2, 4, 16, 16)) > 0.5).astype(jnp.float32)
    t1 = (jax.random.uniform(keys[3], (2, 1, 16, 16)) > 0.5).astype(jnp.float32)

    loss = jax.block_until_ready(loss_fn((x0, x1), (t0, t1)))
    ref = jax.block_until_ready(_reference((x0, x1), (t0, t1), (1.0, 0.5)))
    assert jnp.allclose(loss, ref, rtol=1e-5, atol=1e-5), (loss, ref)

    # Case 2: uneven heads, in-kernel overhang mask, misaligned bf16 head.
    y0 = jax.random.normal(keys[4], (2, 4, 40, 40), dtype=jnp.float32)   # 12800 elems
    s0 = (jax.random.uniform(keys[5], (2, 4, 40, 40)) > 0.5).astype(jnp.float32)
    y1 = jax.random.normal(keys[6], (2, 3, 7, 5), dtype=jnp.bfloat16)    # 210 elems
    s1 = (jax.random.uniform(keys[7], (2, 3, 7, 5)) > 0.5).astype(jnp.bfloat16)

    loss2 = jax.block_until_ready(loss_fn((y0, y1), (s0, s1)))
    ref2 = jax.block_until_ready(_reference((y0, y1), (s0, s1), (1.0, 0.5)))
    assert jnp.allclose(loss2, ref2, rtol=1e-5, atol=1e-5), (loss2, ref2)

    print("KERNEL_OK")
</pallas_src>

<mosaic_0001>
module attributes {stable_mosaic.version = 11 : i64} {
  func.func @_fused_bce_kernel(%arg0: i32, %arg1: i32, %arg2: memref<8x128xf32, #tpu.memory_space<vmem>>, %arg3: memref<8x128xf32, #tpu.memory_space<vmem>>, %arg4: memref<8x128xf32, #tpu.memory_space<vmem>>, %arg5: memref<8x128xf32, #tpu.memory_space<vmem>>, %arg6: memref<8x128xf32, #tpu.memory_space<vmem>>, %arg7: memref<8x128xf32, #tpu.memory_space<vmem>>, %arg8: memref<8x128xf32, #tpu.memory_space<vmem>>) attributes {dimension_semantics = [#tpu.dimension_semantics<parallel>, #tpu.dimension_semantics<arbitrary>], iteration_bounds = array<i64: 2, 1>, scalar_prefetch = 0 : i64, scratch_operands = 2 : i64, tpu.core_type = #tpu.core_type<tc>, window_params = [{transform_indices = @transform_0, window_bounds = array<i64: 8, 128>}, {transform_indices = @transform_1, window_bounds = array<i64: 8, 128>}, {transform_indices = @transform_2, window_bounds = array<i64: 8, 128>}, {transform_indices = @transform_3, window_bounds = array<i64: 8, 128>}, {transform_indices = @transform_4, window_bounds = array<i64: 8, 128>}]} {
    %c0_i32 = arith.constant 0 : i32
    %0 = arith.cmpi eq, %arg1, %c0_i32 : i32
    %1 = arith.extui %0 : i1 to i32
    %c0_i32_0 = arith.constant 0 : i32
    %2 = arith.cmpi ne, %1, %c0_i32_0 : i32
    scf.if %2 {
      %cst = arith.constant 0.000000e+00 : f32
      %20 = vector.broadcast %cst : f32 to vector<8x128xf32>
      %c0 = arith.constant 0 : index
      %c0_9 = arith.constant 0 : index
      %21 = vector.load %arg7[%c0, %c0_9] : memref<8x128xf32, #tpu.memory_space<vmem>>, vector<8x128xf32>
      tpu.vector_store %arg7[%c0, %c0_9], %20 {strides = array<i32>} : memref<8x128xf32, #tpu.memory_space<vmem>>, vector<8x128xf32>,
      %cst_10 = arith.constant 0.000000e+00 : f32
      %22 = vector.broadcast %cst_10 : f32 to vector<8x128xf32>
      %c0_11 = arith.constant 0 : index
      %c0_12 = arith.constant 0 : index
      %23 = vector.load %arg8[%c0_11, %c0_12] : memref<8x128xf32, #tpu.memory_space<vmem>>, vector<8x128xf32>
      tpu.vector_store %arg8[%c0_11, %c0_12], %22 {strides = array<i32>} : memref<8x128xf32, #tpu.memory_space<vmem>>, vector<8x128xf32>,
    } else {
    }
    %c1_i32 = arith.constant 1 : i32
    %3 = arith.muli %arg0, %c1_i32 : i32
    %4 = arith.addi %3, %arg1 : i32
    %c1_i32_1 = arith.constant 1 : i32
    %5 = arith.cmpi slt, %arg1, %c1_i32_1 : i32
    %c2_i32 = arith.constant 2 : i32
    %6 = arith.cmpi slt, %4, %c2_i32 : i32
    %7 = arith.andi %5, %6 : i1
    %8 = arith.extui %7 : i1 to i32
    %c0_i32_2 = arith.constant 0 : i32
    %9 = arith.cmpi ne, %8, %c0_i32_2 : i32
    scf.if %9 {
      %c0 = arith.constant 0 : index
      %c0_9 = arith.constant 0 : index
      %20 = vector.load %arg2[%c0, %c0_9] : memref<8x128xf32, #tpu.memory_space<vmem>>, vector<8x128xf32>
      %c0_10 = arith.constant 0 : index
      %c0_11 = arith.constant 0 : index
      %21 = vector.load %arg3[%c0_10, %c0_11] : memref<8x128xf32, #tpu.memory_space<vmem>>, vector<8x128xf32>
      %cst = arith.constant 0.000000e+00 : f32
      %22 = vector.broadcast %cst : f32 to vector<8x128xf32>
      %23 = arith.maximumf %20, %22 : vector<8x128xf32>
      %24 = arith.mulf %20, %21 : vector<8x128xf32>
      %25 = arith.subf %23, %24 : vector<8x128xf32>
      %26 = math.absf %20 : vector<8x128xf32>
      %cst_12 = arith.constant 0.000000e+00 : f32
      %27 = vector.broadcast %cst_12 : f32 to vector<8x128xf32>
      %28 = arith.subf %27, %26 : vector<8x128xf32>
      %29 = math.exp %28 : vector<8x128xf32>
      %30 = math.log1p %29 : vector<8x128xf32>
      %31 = arith.addf %25, %30 : vector<8x128xf32>
      %c0_13 = arith.constant 0 : index
      %c0_14 = arith.constant 0 : index
      %32 = vector.load %arg7[%c0_13, %c0_14] : memref<8x128xf32, #tpu.memory_space<vmem>>, vector<8x128xf32>
      %33 = vector.shape_cast %31 : vector<8x128xf32> to vector<1x8x128xf32>
      %cst_15 = arith.constant dense<0.000000e+00> : vector<8x128xf32>
      %34 = vector.multi_reduction <add>, %33, %cst_15 [0] : vector<1x8x128xf32> to vector<8x128xf32>
      %35 = arith.addf %32, %34 : vector<8x128xf32>
      %c0_16 = arith.constant 0 : index
      %c0_17 = arith.constant 0 : index
      %36 = vector.load %arg7[%c0_16, %c0_17] : memref<8x128xf32, #tpu.memory_space<vmem>>, vector<8x128xf32>
      tpu.vector_store %arg7[%c0_16, %c0_17], %35 {strides = array<i32>} : memref<8x128xf32, #tpu.memory_space<vmem>>, vector<8x128xf32>,
    } else {
    }
    %c1_i32_3 = arith.constant 1 : i32
    %10 = arith.muli %arg0, %c1_i32_3 : i32
    %11 = arith.addi %10, %arg1 : i32
    %c1_i32_4 = arith.constant 1 : i32
    %12 = arith.cmpi slt, %arg1, %c1_i32_4 : i32
    %c1_i32_5 = arith.constant 1 : i32
    %13 = arith.cmpi slt, %11, %c1_i32_5 : i32
    %14 = arith.andi %12, %13 : i1
    %15 = arith.extui %14 : i1 to i32
    %c0_i32_6 = arith.constant 0 : i32
    %16 = arith.cmpi ne, %15, %c0_i32_6 : i32
    scf.if %16 {
      %c0 = arith.constant 0 : index
      %c0_9 = arith.constant 0 : index
      %20 = vector.load %arg4[%c0, %c0_9] : memref<8x128xf32, #tpu.memory_space<vmem>>, vector<8x128xf32>
      %c0_10 = arith.constant 0 : index
      %c0_11 = arith.constant 0 : index
      %21 = vector.load %arg5[%c0_10, %c0_11] : memref<8x128xf32, #tpu.memory_space<vmem>>, vector<8x128xf32>
      %cst = arith.constant 0.000000e+00 : f32
      %22 = vector.broadcast %cst : f32 to vector<8x128xf32>
      %23 = arith.maximumf %20, %22 : vector<8x128xf32>
      %24 = arith.mulf %20, %21 : vector<8x128xf32>
      %25 = arith.subf %23, %24 : vector<8x128xf32>
      %26 = math.absf %20 : vector<8x128xf32>
      %cst_12 = arith.constant 0.000000e+00 : f32
      %27 = vector.broadcast %cst_12 : f32 to vector<8x128xf32>
      %28 = arith.subf %27, %26 : vector<8x128xf32>
      %29 = math.exp %28 : vector<8x128xf32>
      %30 = math.log1p %29 : vector<8x128xf32>
      %31 = arith.addf %25, %30 : vector<8x128xf32>
      %c0_13 = arith.constant 0 : index
      %c0_14 = arith.constant 0 : index
      %32 = vector.load %arg8[%c0_13, %c0_14] : memref<8x128xf32, #tpu.memory_space<vmem>>, vector<8x128xf32>
      %33 = vector.shape_cast %31 : vector<8x128xf32> to vector<1x8x128xf32>
      %cst_15 = arith.constant dense<0.000000e+00> : vector<8x128xf32>
      %34 = vector.multi_reduction <add>, %33, %cst_15 [0] : vector<1x8x128xf32> to vector<8x128xf32>
      %35 = arith.addf %32, %34 : vector<8x128xf32>
      %c0_16 = arith.constant 0 : index
      %c0_17 = arith.constant 0 : index
      %36 = vector.load %arg8[%c0_16, %c0_17] : memref<8x128xf32, #tpu.memory_space<vmem>>, vector<8x128xf32>
      tpu.vector_store %arg8[%c0_16, %c0_17], %35 {strides = array<i32>} : memref<8x128xf32, #tpu.memory_space<vmem>>, vector<8x128xf32>,
    } else {
    }
    %c0_i32_7 = arith.constant 0 : i32
    %17 = arith.cmpi eq, %arg1, %c0_i32_7 : i32
    %18 = arith.extui %17 : i1 to i32
    %c0_i32_8 = arith.constant 0 : i32
    %19 = arith.cmpi ne, %18, %c0_i32_8 : i32
    scf.if %19 {
      %c0 = arith.constant 0 : index
      %c0_9 = arith.constant 0 : index
      %20 = vector.load %arg7[%c0, %c0_9] : memref<8x128xf32, #tpu.memory_space<vmem>>, vector<8x128xf32>
      %cst = arith.constant 4.8828125E-4 : f32
      %21 = vector.broadcast %cst : f32 to vector<8x128xf32>
      %22 = arith.mulf %20, %21 : vector<8x128xf32>
      %c0_10 = arith.constant 0 : index
      %c0_11 = arith.constant 0 : index
      %23 = vector.load %arg8[%c0_10, %c0_11] : memref<8x128xf32, #tpu.memory_space<vmem>>, vector<8x128xf32>
      %cst_12 = arith.constant 9.765625E-4 : f32
      %24 = vector.broadcast %cst_12 : f32 to vector<8x128xf32>
      %25 = arith.mulf %23, %24 : vector<8x128xf32>
      %26 = arith.addf %22, %25 : vector<8x128xf32>
      %c0_13 = arith.constant 0 : index
      %c0_14 = arith.constant 0 : index
      %27 = vector.load %arg6[%c0_13, %c0_14] : memref<8x128xf32, #tpu.memory_space<vmem>>, vector<8x128xf32>
      tpu.vector_store %arg6[%c0_13, %c0_14], %26 {strides = array<i32>} : memref<8x128xf32, #tpu.memory_space<vmem>>, vector<8x128xf32>,
    } else {
    }
    return
  }
  func.func @transform_0(%arg0: i32, %arg1: i32) -> (i32, i32) {
    %c1_i32 = arith.constant 1 : i32
    %0 = arith.muli %arg0, %c1_i32 : i32
    %c0_i32 = arith.constant 0 : i32
    %1 = arith.minsi %arg1, %c0_i32 : i32
    %2 = arith.addi %0, %1 : i32
    %c1_i32_0 = arith.constant 1 : i32
    %3 = arith.minsi %2, %c1_i32_0 : i32
    %c0_i32_1 = arith.constant 0 : i32
    %c0_i32_2 = arith.constant 0 : i32
    return %3, %c0_i32_1 : i32, i32
  }
  func.func @transform_1(%arg0: i32, %arg1: i32) -> (i32, i32) {
    %c1_i32 = arith.constant 1 : i32
    %0 = arith.muli %arg0, %c1_i32 : i32
    %c0_i32 = arith.constant 0 : i32
    %1 = arith.minsi %arg1, %c0_i32 : i32
    %2 = arith.addi %0, %1 : i32
    %c1_i32_0 = arith.constant 1 : i32
    %3 = arith.minsi %2, %c1_i32_0 : i32
    %c0_i32_1 = arith.constant 0 : i32
    %c0_i32_2 = arith.constant 0 : i32
    return %3, %c0_i32_1 : i32, i32
  }
  func.func @transform_2(%arg0: i32, %arg1: i32) -> (i32, i32) {
    %c1_i32 = arith.constant 1 : i32
    %0 = arith.muli %arg0, %c1_i32 : i32
    %c0_i32 = arith.constant 0 : i32
    %1 = arith.minsi %arg1, %c0_i32 : i32
    %2 = arith.addi %0, %1 : i32
    %c0_i32_0 = arith.constant 0 : i32
    %3 = arith.minsi %2, %c0_i32_0 : i32
    %c0_i32_1 = arith.constant 0 : i32
    %c0_i32_2 = arith.constant 0 : i32
    return %3, %c0_i32_1 : i32, i32
  }
  func.func @transform_3(%arg0: i32, %arg1: i32) -> (i32, i32) {
    %c1_i32 = arith.constant 1 : i32
    %0 = arith.muli %arg0, %c1_i32 : i32
    %c0_i32 = arith.constant 0 : i32
    %1 = arith.minsi %arg1, %c0_i32 : i32
    %2 = arith.addi %0, %1 : i32
    %c0_i32_0 = arith.constant 0 : i32
    %3 = arith.minsi %2, %c0_i32_0 : i32
    %c0_i32_1 = arith.constant 0 : i32
    %c0_i32_2 = arith.constant 0 : i32
    return %3, %c0_i32_1 : i32, i32
  }
  func.func @transform_4(%arg0: i32, %arg1: i32) -> (i32, i32) {
    %c0_i32 = arith.constant 0 : i32
    %c0_i32_0 = arith.constant 0 : i32
    return %arg0, %c0_i32 : i32, i32
  }
}

</mosaic_0001>

<bundles_post_ra>
// kernel: tpu_custom_call.1
= control target key start
LH: loop header
LB: loop body
LE: loop exit
PB: predicated region body
PF: predicated region fallthrough
CT: control target
= control target key end

     0   :  { %s1388_s0 = inlined_call_operand.hbm [shape: f32[16,128], index: 0, kind: input, shape index: {}]   ;;  %s1389_s1 = inlined_call_operand.hbm [shape: f32[16,128], index: 1, kind: input, shape index: {}]   ;;  %s1390_s2 = inlined_call_operand.hbm [shape: f32[8,128], index: 2, kind: input, shape index: {}]   ;;  %s1391_s3 = inlined_call_operand.vmem [shape: f32[8,128], index: 3, kind: input, shape index: {}]   ;;  %s1392_s4 = inlined_call_operand.hbm [shape: f32[16,128], index: 4, kind: output, shape index: {}]  }
   0x1   :  { %1405 = sst [smem:[#allocation20_spill]] %s1389_s1 }
   0x2   :  { %9 = vsyncpa [#allocation5], 0 }
   0x3   :  { %11 = vsyncpa [#allocation5 + $0x1], 0 }
   0x4   :  { %12 = vsyncpa [#allocation8], 0 }
   0x5   :  { %14 = vsyncpa [#allocation8 + $0x1], 0 }
   0x6   :  { %15 = vsyncpa [#allocation6], 0 }
   0x7   :  { %17 = vsyncpa [#allocation6 + $0x1], 0  ;;  %s1041_s15 = smov 0   ;;  %s1043_s16 = smov 0  }
   0x8   :  { %s1045_s17 = smov 0   ;;  %s1047_s18 = smov 0  }
   0x9   :  { %s1049_s19 = smov 0   ;;  %s1051_s20 = smov 0  }
   0xa   :  { %s1053_s21 = smov 0   ;;  %s1055_s22 = smov 0  }
   0xb   :  { %s1057_s23 = smov 0   ;;  %s1059_s24 = smov 0  }
   0xc   :  { %s1061_s25 = smov 0  }
   0xd LB: > { %1406 = sst [smem:[#allocation15_spill]] %s977_s17  ;;  %s1095_s26 = sadd.s32 4294967295, %s1009_s25   ;;  %s1009_s25 = sphi %s1061_s25, %s23_s25   ;;  %s1005_s24 = sphi %s1059_s24, %s1437_s24   ;;  %s1001_s23 = sphi %s1057_s23, %s1436_s23   ;;  %s997_s22 = sphi %s1055_s22, %s1443_s22   ;;  %s993_s21 = sphi %s1053_s21, %s1442_s21   ;;  %s989_s20 = sphi %s1051_s20, %s1441_s20   ;;  %s985_s19 = sphi %s1049_s19, %s1369_s19   ;;  %s981_s18 = sphi %s1047_s18, %s1440_s18   ;;  %s977_s17 = sphi %s1045_s17, %s1434_s17   ;;  %s973_s16 = sphi %s1043_s16, %s1439_s16   ;;  %s969_s15 = sphi %s1041_s15, %s1438_s15  }
   0xe   : > { %1407 = sst [smem:[#allocation16_spill]] %s1005_s24  ;;  %s629_s27 = sadd.s32 4294967294, %s1009_s25  }
   0xf   : > { %s35_s28 = sadd.s32 1, %s1005_s24  ;;  %p42_p0 = scmp.lt.s32.totalorder %s1005_s24, 1 }
  0x10   : > { %p37_p1 = scmp.ge.s32.totalorder %s35_s28, 2  ;;  %s52_s29 = sadd.s32 1, %s997_s22 }
  0x11   : > { %s1102_s30 = scalar_select %p42_p0, %s1005_s24, 1 }
  0x12   : > { %s1445_s28 = smov (%p37_p1, %s35_s28), 0  ;;  %p59_p2 = scmp.ne.s32.totalorder %s997_s22, %s993_s21 }
  0x13   : > { %1408 = sst [smem:[#allocation17_spill]] %s1445_s28  ;;  %p1400_p3 = scmp.eq.s32.totalorder %s1009_s25, 0 }
  0x14   : > { %p47_p4 = scmp.lt.s32.totalorder %s1445_s28, 1  ;;  %p65_p5 = scmp.ne.s32.totalorder %s993_s21, %s989_s20 }
  0x15   : > { %p1113_p6 = por %p1400_p3, %p59_p2  ;;  %p1399_p7 = scmp.eq.s32.totalorder %s1095_s26, 0 }
  0x16   : > { %s48_s6 = scalar_select %p47_p4, %s1445_s28, 1 }
  0x17   : > { %p1121_p8 = por %p1399_p7, %p65_p5  ;;  %s183_s8 = ssub.s32 %s1005_s24, %s1445_s28 }
  0x18   : > { %s49_s9 = ssub.s32 %s1102_s30, %s48_s6  ;;  %p184_p9 = scmp.eq.s32.totalorder %s183_s8, 0 }
  0x19   : > { %s1410_s7 = scalar_select %p1121_p8, 1, 0 }
  0x1a   : > { %p50_p10 = scmp.eq.s32.totalorder %s49_s9, 0  ;;  %s186_s10 = sadd.s32 1, %s977_s17 }
  0x1b   : > { %s1130_s11 = scalar_select %p184_p9, %s977_s17, %s186_s10  }
  0x1c   : > { %s1133_s12 = scalar_select %p50_p10, %s997_s22, %s52_s29  }
  0x1d   : > { %1411 = sst [smem:[#allocation18_spill]] %s1130_s11  ;;  %p196_p11 = scmp.ne.s32.totalorder %s977_s17, %s973_s16 }
  0x1e   : > { %1412 = sst [smem:[#allocation19_spill]] %s1133_s12  ;;  %p197_p12 = scmp.eq.s32.totalorder %s1095_s26, 1 }
  0x1f   : > { %p202_p13 = scmp.ne.s32.totalorder %s973_s16, %s969_s15  ;;  %p203_p0 = scmp.eq.s32.totalorder %s629_s27, 1 }
  0x20   : > { %p1140_p1 = por %p197_p12, %p196_p11  ;;  %p1398_p5 = scmp.lt.s32.totalorder %s1009_s25, 2 }
  0x21   : > { %p1145_p4 = por %p203_p0, %p202_p13  ;;  %s1394_s20 = sand.u32 1, %s997_s22  }
  0x22   : > { %s1413_s13 = scalar_select %p1140_p1, 1, 0 }
  0x23   : > { %s1414_s14 = scalar_select %p1145_p4, 1, 0 }
  0x24   : > { %s1396_s6 = sshll.u32 %s1102_s30, 7  ;;  %s1154_s29 = sshll.u32 %s1394_s20, 3 }
  0x25   : > { %p1160_p9 = pnand %p1398_p5, %p1113_p6  ;;  %s246_s8 = sand.u32 1, %s1009_s25  }
  0x26   : > { %s1416_s1 = sld [smem:[#allocation20_spill]]  ;;  %s250_s5 = scalar_lea.vmem [#allocation7], %s1154_s29 }
  0x27   : > { %s262_s20 = sshll.u32 %s250_s5, 4  ;;  %s1176_s24 = scalar_lea.sflag [#allocation8], %s246_s8  ;;  %s1173_s20 = int_to_ptr.vmem [resolvable:$true] %s262_s20 }
  0x28   : > { %p786_p11 = pneg %p1160_p9 }
  0x2c   : > { %s1170_s28 = scalar_lea.hbm %s1416_s1, %s1396_s6  ;;  %s789_s6 = scalar_lea.hbm %s1416_s1, 256 }
  0x2d   : > { %s784_s12 = scalar_lea.hbm %s1170_s28, 128  ;;  %p790_p0 = scmp.lt.u32.totalorder %s1170_s28, %s1416_s1 }
  0x2e   : > { %p785_p10 = scmp.ne.s32.totalorder %s1170_s28, %s784_s12  ;;  %p791_p2 = scmp.lt.u32.totalorder %s789_s6, %s784_s12 }
  0x2f   : > { %p793_p7 = scmp.lt.u32.totalorder %s784_s12, %s1170_s28 }
  0x30   : > { %p787_p12 = pnand %p786_p11, %p785_p10  ;;  %p792_p5 = por %p791_p2, %p790_p0 }
  0x32   : > { %p788_p13 = pneg %p787_p12  ;;  %p794_p3 = por %p793_p7, %p792_p5 }
  0x34   : > { %p795_p6 = pnand %p794_p3, %p788_p13 }
  0x36   : > { %798 = shalt.err (!%p795_p6)
}
  0x37   : > { %s799_s8 = scalar_lea.vmem %s1173_s20, 128  ;;  %s1011_s5 = smov [#allocation7]  }
  0x38   : > { %p800_p10 = scmp.ne.s32.totalorder %s1173_s20, %s799_s8  ;;  %s804_s9 = sshll.u32 %s1011_s5, 4  ;;  %s805_s9 = int_to_ptr.vmem [resolvable:$false] %s804_s9 }
  0x39   : > { %s806_s17 = scalar_lea.vmem %s805_s9, 256  ;;  %p807_p1 = scmp.lt.s32.totalorder %s1173_s20, %s805_s9 }
  0x3a   : > { %p802_p12 = pnand %p800_p10, %p786_p11  ;;  %p808_p2 = scmp.lt.s32.totalorder %s806_s17, %s799_s8 }
  0x3c   : > { %p803_p4 = pneg %p802_p12  ;;  %p809_p0 = por %p808_p2, %p807_p1 }
  0x3e   : > { %p810_p7 = pnand %p809_p0, %p803_p4 }
  0x40   : > { %813 = shalt.err (!%p810_p7)
}
  0x41   : > { %669 = dma.hbm_to_vmem [thread:$0]  (!%p1160_p9), %s1170_s28, 128, %s1173_s20, %s1176_s24  }
  0x42   : > { %p307_p3 = scmp.lt.s32.totalorder %s1009_s25, 3  ;;  %p1417_p5 = scmp.ge.s32.totalorder %s1009_s25, 1 }
  0x43   : > { %s1419_s12 = sshll.u32 %s1102_s30, 7  ;;  %s227_s5 = scalar_lea.vmem [#allocation4], %s1154_s29 }
  0x44   : > { %p1207_p6 = pnand %p1417_p5, %p307_p3  ;;  %s1216_s8 = scalar_lea.hbm %s1388_s0, %s1419_s12 }
  0x45   : > { %s239_s9 = sshll.u32 %s227_s5, 4  ;;  %s1420_s28 = sand.u32 1, %s997_s22   ;;  %s240_s9 = int_to_ptr.vmem [resolvable:$true] %s239_s9 }
  0x46   : > { %s1418_s11 = scalar_select %p1207_p6, 1, 0 }
  0x47   : > { %s224_s20 = scalar_lea.sflag [#allocation5], %s1420_s28  ;;  %s814_s17 = scalar_lea.hbm %s1216_s8, 128 }
  0x48   : > { %p815_p1 = scmp.ne.s32.totalorder %s1216_s8, %s814_s17  ;;  %s819_s12 = scalar_lea.hbm %s1388_s0, 256 }
  0x49   : > { %p820_p10 = scmp.lt.u32.totalorder %s1216_s8, %s1388_s0  ;;  %p821_p12 = scmp.lt.u32.totalorder %s819_s12, %s814_s17 }
  0x4a   : > { %p817_p4 = pnand %p815_p1, %p786_p11  ;;  %p823_p0 = scmp.lt.u32.totalorder %s814_s17, %s1216_s8 }
  0x4b   : > { %p822_p2 = por %p821_p12, %p820_p10 }
  0x4c   : > { %p818_p13 = pneg %p817_p4 }
  0x4d   : > { %p824_p7 = por %p823_p0, %p822_p2 }
  0x4f   : > { %p825_p3 = pnand %p824_p7, %p818_p13 }
  0x51   : > { %828 = shalt.err (!%p825_p3)
}
  0x52   : > { %s829_s29 = scalar_lea.vmem %s240_s9, 128  ;;  %s1012_s5 = smov [#allocation4]  }
  0x53   : > { %p830_p5 = scmp.ne.s32.totalorder %s240_s9, %s829_s29  ;;  %s834_s1 = sshll.u32 %s1012_s5, 4  ;;  %s835_s1 = int_to_ptr.vmem [resolvable:$false] %s834_s1 }
  0x54   : > { %s836_s28 = scalar_lea.vmem %s835_s1, 256  ;;  %p837_p8 = scmp.lt.s32.totalorder %s240_s9, %s835_s1 }
  0x55   : > { %p832_p1 = pnand %p830_p5, %p786_p11  ;;  %p838_p6 = scmp.lt.s32.totalorder %s836_s28, %s829_s29 }
  0x57   : > { %p833_p4 = pneg %p832_p1  ;;  %p839_p10 = por %p838_p6, %p837_p8 }
  0x59   : > { %p840_p12 = pnand %p839_p10, %p833_p4 }
  0x5b   : > { %843 = shalt.err (!%p840_p12)
}
  0x5c   : > { %666 = dma.hbm_to_vmem [thread:$0]  (!%p1160_p9), %s1216_s8, 128, %s240_s9, %s224_s20  }
  0x5d   : > { %p966_p11 = scmp.ne.s32.totalorder %s985_s19, 0  ;;  %p137_p13 = scmp.ne.s32.totalorder %s985_s19, %s981_s18 }
  0x5e   : > { %p1421_p2 = scmp.eq.s32.totalorder %s1009_s25, 0  ;;  %p1422_p7 = scmp.eq.s32.totalorder %s1095_s26, 0 }
  0x5f   : > { %s1013_s30 = smov [#allocation9]   ;;  %p1424_p8 = scmp.lt.s32.totalorder %s1009_s25, 2 }
  0x60   : > { %p133_p0 = por %p966_p11, %p1421_p2  ;;  %p1247_p3 = por %p137_p13, %p1422_p7 }
  0x61   : > { %s285_s12 = sshll.u32 %s1013_s30, 4  ;;  %s844_s18 = scalar_lea.hbm %s1390_s2, 128  ;;  %s286_s12 = int_to_ptr.vmem [resolvable:$true] %s285_s12 }
  0x62   : > { %s1423_s17 = scalar_select %p1247_p3, 1, 0 }
  0x63   : > { %p1253_p6 = pnand %p1424_p8, %p133_p0  ;;  %p845_p9 = scmp.ne.s32.totalorder %s1390_s2, %s844_s18 }
  0x64   : > { %p851_p10 = scmp.lt.u32.totalorder %s844_s18, %s844_s18  ;;  %p853_p12 = scmp.lt.u32.totalorder %s844_s18, %s1390_s2 }
  0x65   : > { %s1425_s27 = scalar_select %p1253_p6, 1, 0 }
  0x66   : > { %p846_p5 = pneg %p1253_p6  ;;  %p854_p11 = por %p853_p12, %p851_p10 }
  0x68   : > { %p847_p1 = pnand %p846_p5, %p845_p9 }
  0x6a   : > { %p848_p4 = pneg %p847_p1 }
  0x6c   : > { %p855_p13 = pnand %p854_p11, %p848_p4 }
  0x6e   : > { %858 = shalt.err (!%p855_p13)
}
  0x6f   : > { %s859_s5 = scalar_lea.vmem %s286_s12, 128  ;;  %s866_s1 = scalar_lea.vmem %s286_s12, 256 }
  0x70   : > { %p860_p2 = scmp.ne.s32.totalorder %s286_s12, %s859_s5  ;;  %p867_p8 = scmp.lt.s32.totalorder %s286_s12, %s286_s12 }
  0x71   : > { %p868_p3 = scmp.lt.s32.totalorder %s866_s1, %s859_s5 }
  0x72   : > { %p862_p0 = pnand %p860_p2, %p846_p5 }
  0x73   : > { %p869_p6 = por %p868_p3, %p867_p8 }
  0x74   : > { %p863_p7 = pneg %p862_p0 }
  0x76   : > { %p870_p9 = pnand %p869_p6, %p863_p7 }
  0x78   : > { %873 = shalt.err (!%p870_p9)
}
  0x79   : > { %p1426_p1 = scmp.ne.s32.totalorder %s1425_s27, 0  ;;  %p1427_p4 = scmp.ne.s32.totalorder %s1418_s11, 0 }
  0x7a   : > { %s313_s6 = sand.u32 (!%p1427_p4), 1, %s993_s21   ;;  %p1428_p3 = scmp.ne.s32.totalorder (!%p1427_p4), %s1410_s7, 0 }
  0x7b   : > { %672 = dma.hbm_to_vmem [thread:$0]  (!%p1426_p1), %s1390_s2, 128, %s286_s12, %s1176_s24  }
  0x7c   : > { %311 = sbr.rel (%p1427_p4) target bundleno = 246 (0xf6), region = 36  ;;  %s1277_s10 = sshll.u32 (!%p1427_p4), %s313_s6, 3 }
  0x7d   : > { %s314_s18 = scalar_lea.sflag (!%p1427_p4), [#allocation5], %s313_s6  ;;  %s317_s8 = scalar_lea.vmem (!%p1427_p4), [#allocation4], %s1277_s10 }
  0x83   : > { %951 = dma.done.wait (%p1428_p3), %s314_s18, 128  }
  0x84   : > { %953 = vsyncadd (%p1428_p3), %s314_s18, 4294967168  ;;  %s322_s24 = sand.u32 1, %s1095_s26   ;;  %s326_s11 = scalar_lea.vmem [#allocation7], %s1277_s10 }
  0x85   : > { %s323_s12 = scalar_lea.sflag [#allocation8], %s322_s24 }
  0x86   : > { %955 = dma.done.wait (%p1428_p3), %s323_s12, 128  }
  0x87   : > { %957 = vsyncadd (%p1428_p3), %s323_s12, 4294967168  ;;  %s333_s27 = sand.u32 1, %s985_s19   ;;  %p1429_p6 = scmp.ne.s32.totalorder %s1423_s17, 0 }
  0x88   : > { %s1291_s9 = sshll.u32 %s333_s27, 3 }
  0x89   : > { %s335_s20 = scalar_lea.vmem [#allocation9], %s1291_s9 }
  0x8a   : > { %959 = dma.done.wait (%p1429_p6), %s323_s12, 128  }
  0x8b   : > { %961 = vsyncadd (%p1429_p6), %s323_s12, 4294967168  ;;  %s376_s26 = sand.u32 1, %s973_s16   ;;  %p397_p5 = scmp.lt.s32.totalorder %s1001_s23, 0  ;;  %v1014_v0 = vmov 0.0  }
  0x8c   : > { %s1302_s7 = sshll.u32 %s376_s26, 3  ;;  %412 = vst [vmem:[#allocation2] sm:$0xff] %v1014_v0  ;;  %413 = vst [vmem:[#allocation3] sm:$0xff] %v1014_v0  ;;  %p416_p10 = scmp.lt.s32.totalorder %s1001_s23, 2 }
  0x8d   : > { %s398_s29 = scalar_select %p397_p5, %s1001_s23, 0 }
  0x8e   : > { %s378_s30 = scalar_lea.vmem [#allocation10], %s1302_s7  ;;  %420 = sbr.rel (!%p416_p10) target bundleno = 181 (0xb5), region = 56  ;;  %v421_v1 = vld [vmem:[%s317_s8] sm:$0xff] (%p416_p10)  ;;  %v422_v8 = vld [vmem:[%s326_s11] sm:$0xff] (%p416_p10) }
  0x8f   : > { %s1447_s29 = smov (!%p397_p5, %s398_s29), 0  ;;  %v426_v2 = vand.u32 (%p416_p10), 2147483647, %v421_v1  ;;  %v423_v10 = vmax.f32 (%p416_p10), %v421_v1, 0.0  ;;  %v424_v11 = vmul.f32 (%p416_p10), %v422_v8, %v421_v1 }
  0x90   : > { %s646_s5 = sshll.u32 %s1447_s29, 3 }
  0x91   : > { %s1309_s28 = scalar_lea.vmem %s1391_s3, %s646_s5  ;;  %v427_v3 = vsub.f32 (%p416_p10), 0.0, %v426_v2  ;;  %v425_v15 = vsub.f32 (%p416_p10), %v423_v10, %v424_v11 }
  0x93   : > { %v428_v4 = vmul.f32 (%p416_p10), 1.442695, %v427_v3  ;;  %v440_v18 = vld [vmem:[#allocation2] sm:$0xff] (%p416_p10) }
  0x95   : > { %776 = vpow2.f32 %v428_v4 }
  0x9f   : > { %v777_v5 = vpop.eup %776 }
  0xa0   : > { %v430_v6 = vadd.f32 1.0, %v777_v5  ;;  %v433_v7 = vmul.f32 -0.5, %v777_v5  ;;  %v436_v12 = vand.u32 2147483647, %v777_v5 }
  0xa2   : > { %778 = vlog2.f32 %v430_v6  ;;  %v434_v9 = vadd.f32 1.0, %v433_v7  ;;  %vm437_vm0 = vcmp.lt.f32.partialorder %v436_v12, 0.0004427343 }
  0xa4   : > { %v435_v13 = vmul.f32 %v777_v5, %v434_v9 }
  0xac   : > { %v779_v14 = vpop.eup %778 }
  0xad   : > { %v432_v16 = vmul.f32 0.6931472, %v779_v14 }
  0xaf   : > { %v438_v17 = vsel %vm437_vm0, %v435_v13, %v432_v16 }
  0xb0   : > { %v439_v19 = vadd.f32 %v438_v17, %v425_v15 }
  0xb2   : > { %v442_v20 = vadd.f32 %v440_v18, %v439_v19 }
  0xb4   : > { %443 = vst [vmem:[#allocation2] sm:$0xff] %v442_v20 }
  0xb5 PF: > { %p444_p12 = scmp.lt.s32.totalorder %s1001_s23, 1 }
  0xb6   : > { %v449_v21 = vld [vmem:[%s335_s20] sm:$0xff] (%p444_p12)  ;;  %v450_v28 = vld [vmem:[%s1309_s28] sm:$0xff] (%p444_p12)  ;;  %v468_v38 = vld [vmem:[#allocation3] sm:$0xff] (%p444_p12) }
  0xb7   : > { %448 = sbr.rel (!%p444_p12) target bundleno = 221 (0xdd), region = 60  ;;  %v454_v22 = vand.u32 (%p444_p12), 2147483647, %v449_v21  ;;  %v451_v30 = vmax.f32 (%p444_p12), %v449_v21, 0.0  ;;  %v452_v31 = vmul.f32 (%p444_p12), %v450_v28, %v449_v21 }
  0xb9   : > { %v455_v23 = vsub.f32 (%p444_p12), 0.0, %v454_v22  ;;  %v453_v35 = vsub.f32 (%p444_p12), %v451_v30, %v452_v31 }
  0xbb   : > { %v456_v24 = vmul.f32 (%p444_p12), 1.442695, %v455_v23 }
  0xbd   : > { %780 = vpow2.f32 (%p444_p12), %v456_v24 }
  0xc7   : > { %v781_v25 = vpop.eup %780 }
  0xc8   : > { %v458_v26 = vadd.f32 1.0, %v781_v25  ;;  %v461_v27 = vmul.f32 -0.5, %v781_v25  ;;  %v464_v32 = vand.u32 2147483647, %v781_v25 }
  0xca   : > { %782 = vlog2.f32 %v458_v26  ;;  %v462_v29 = vadd.f32 1.0, %v461_v27  ;;  %vm465_vm1 = vcmp.lt.f32.partialorder %v464_v32, 0.0004427343 }
  0xcc   : > { %v463_v33 = vmul.f32 %v781_v25, %v462_v29 }
  0xd4   : > { %v783_v34 = vpop.eup %782 }
  0xd5   : > { %v460_v36 = vmul.f32 0.6931472, %v783_v34 }
  0xd7   : > { %v466_v37 = vsel %vm465_vm1, %v463_v33, %v460_v36 }
  0xd8   : > { %v467_v39 = vadd.f32 %v466_v37, %v453_v35 }
  0xda   : > { %v470_v40 = vadd.f32 %v468_v38, %v467_v39 }
  0xdc   : > { %471 = vst [vmem:[#allocation3] sm:$0xff] %v470_v40 }
  0xdd PF: > { %v475_v41 = vld [vmem:[#allocation2] sm:$0xff]  ;;  %s650_s6 = sshll.u32 %s1001_s23, 7  ;;  %s495_s10 = sshll.u32 %s378_s30, 4  ;;  %s1324_s10 = int_to_ptr.vmem [resolvable:$true] %s495_s10 }
  0xde   : > { %v476_v43 = vmul.f32 0.00048828125, %v475_v41  ;;  %s1322_s24 = scalar_lea.hbm %s1392_s4, %s650_s6  ;;  %s482_s12 = scalar_lea.sflag [#allocation6], %s376_s26 }
  0xdf   : > { %s874_s23 = scalar_lea.vmem %s1324_s10, 128  ;;  %p1430_p13 = scmp.ne.s32.totalorder %s1413_s13, 0 }
  0xe0   : > { %p875_p11 = scmp.ne.s32.totalorder %s1324_s10, %s874_s23  ;;  %s1015_s11 = smov [#allocation10]  }
  0xe1   : > { %s878_s27 = sshll.u32 %s1015_s11, 4  ;;  %s879_s27 = int_to_ptr.vmem [resolvable:$false] %s878_s27 }
  0xe2   : > { %p876_p2 = pnand %p875_p11, %p1430_p13  ;;  %s880_s9 = scalar_lea.vmem %s879_s27, 256 }
  0xe3   : > { %v477_v42 = vld [vmem:[#allocation3] sm:$0xff]  ;;  %p881_p7 = scmp.lt.s32.totalorder %s1324_s10, %s879_s27  ;;  %p882_p8 = scmp.lt.s32.totalorder %s880_s9, %s874_s23 }
  0xe4   : > { %v478_v44 = vmul.f32 0.0009765625, %v477_v42  ;;  %p877_p0 = pneg %p876_p2 }
  0xe5   : > { %p883_p9 = por %p882_p8, %p881_p7 }
  0xe6   : > { %v479_v45 = vadd.f32 %v478_v44, %v476_v43 }
  0xe7   : > { %p884_p1 = pnand %p883_p9, %p877_p0 }
  0xe8   : > { %480 = vst [vmem:[%s378_s30] sm:$0xff] %v479_v45 }
  0xe9   : > { %887 = shalt.err (!%p884_p1)
}
  0xea   : > { %s888_s20 = scalar_lea.hbm %s1322_s24, 128  ;;  %s892_s29 = scalar_lea.hbm %s1392_s4, 256 }
  0xeb   : > { %p889_p4 = scmp.ne.s32.totalorder %s1322_s24, %s888_s20  ;;  %p893_p5 = scmp.lt.u32.totalorder %s1322_s24, %s1392_s4 }
  0xec   : > { %p894_p10 = scmp.lt.u32.totalorder %s892_s29, %s888_s20  ;;  %p896_p11 = scmp.lt.u32.totalorder %s888_s20, %s1322_s24 }
  0xed   : > { %p890_p3 = pnand %p889_p4, %p1430_p13 }
  0xee   : > { %p895_p12 = por %p894_p10, %p893_p5 }
  0xef   : > { %p891_p6 = pneg %p890_p3 }
  0xf0   : > { %p897_p2 = por %p896_p11, %p895_p12 }
  0xf2   : > { %p898_p0 = pnand %p897_p2, %p891_p6 }
  0xf4   : > { %901 = shalt.err (!%p898_p0)
}
  0xf5   : > { %661 = dma.vmem_to_hbm [thread:$0]  (%p1430_p13), %s1324_s10, 128, %s1322_s24, %s482_s12  }
  0xf6 PF: > { %s507_s1 = sand.u32 1, %s969_s15   ;;  %p1431_p7 = scmp.ne.s32.totalorder %s1414_s14, 0 }
  0xf7   : > { %p1432_p8 = scmp.ge.s32.totalorder %s1009_s25, 2  ;;  %s508_s28 = scalar_lea.sflag [#allocation6], %s507_s1 }
  0xf9   : > { %p674_p9 = pnand %p1432_p8, %p1431_p7 }
  0xfb   : > { %963 = dma.done.wait (!%p674_p9), %s508_s28, 128  }
  0xfc   : > { %965 = vsyncadd (!%p674_p9), %s508_s28, 4294967168  ;;  %s23_s25 = sadd.s32 1, %s1009_s25   ;;  %s1433_s30 = sld [smem:[#allocation15_spill]] }
  0xfd   : > { %p20_p1 = scmp.ge.s32.totalorder %s23_s25, 4   ;;  %s1434_s17 = sld [smem:[#allocation18_spill]] }
  0xfe   : > { %s1435_s13 = sld [smem:[#allocation19_spill]]  ;;  %s1436_s23 = sld [smem:[#allocation16_spill]] }
  0xff   : > { %s1437_s24 = sld [smem:[#allocation17_spill]]  ;;  %s1438_s15 = smov %s973_s16 }
 0x100   : > { %s1440_s18 = smov %s985_s19  ;;  %s1369_s19 = smov 0  }
 0x101   : > { %s1441_s20 = smov %s993_s21  ;;  %s1442_s21 = smov %s997_s22 }
 0x102   : > { %s1439_s16 = smov %s1433_s30  ;;  %22 = sbr.rel (!%p20_p1) target bundleno = 13 (0xd), region = 124 }
 0x104   : > { %s1443_s22 = smov %s1435_s13 }
 0x109   :  { %513 = vsyncpa [#allocation5], 1 }
 0x10a   :  { %515 = vsyncpa [#allocation5 + $0x1], 1 }
 0x10b   :  { %516 = vsyncpa [#allocation8], 1 }
 0x10c   :  { %518 = vsyncpa [#allocation8 + $0x1], 1 }
 0x10d   :  { %519 = vsyncpa [#allocation6], 1 }
 0x10e   :  { %521 = vsyncpa [#allocation6 + $0x1], 1 }

</bundles_post_ra>
